<compile_context>
chip_gen: v6e
topology: v6e:2x2x1
jax: 0.10.0
libtpu: 0.0.40
codegen_flags: <defaults>
</compile_context>

<pallas_src>
import jax
import jax.numpy as jnp
from jax.experimental import pallas as pl
from jax.experimental.pallas import tpu as pltpu


def time_encode_kernel(t_ref, w1_ref, b1_ref, wem_ref, bem_ref, o_ref):
    t = t_ref[...]                                           # (TILE_N, 1)
    # Linear(1, H) as an outer product on the VPU (a K=1 MXU matmul is waste).
    out1 = t * w1_ref[...] + b1_ref[...]                     # (TILE_N, H_pad)
    # LeakyReLU (negative_slope = 0.01): max(x, 0.01x) is exact for slope<1.
    out2 = jnp.maximum(out1, 0.01 * out1)
    # Linear(H, H) with the residual folded into (W + I); padded bias columns
    # hold -1e30 so they vanish in the softmax below.
    out = jnp.dot(out2, wem_ref[...],
                  preferred_element_type=jnp.float32) + bem_ref[...]
    # Softmax over the H axis.
    m = jnp.max(out, axis=-1, keepdims=True)
    e = jnp.exp(out - m)
    denom = jnp.sum(e, axis=-1, keepdims=True)
    # approx=False keeps the row-sum-to-1 check within 1e-5.
    o_ref[...] = (e * pl.reciprocal(denom, approx=False)).astype(o_ref.dtype)


def _round_up(x, m):
    return (x + m - 1) // m * m


def prepare_time_encode_params(w1, b1, wem_t, bem):
    """Pad/fold parameters once at init time (hoisted out of the call path).

    w1 (1,H), b1 (1,H), wem_t (H,H) (= em.weight.T), bem (1,H)  ->  padded set.
    """
    H = w1.shape[-1]
    H_pad = _round_up(H, 128)                                # lane-dense output
    w1_p = jnp.zeros((1, H_pad), jnp.float32).at[:, :H].set(
        jnp.asarray(w1, jnp.float32).reshape(1, H))
    b1_p = jnp.zeros((1, H_pad), jnp.float32).at[:, :H].set(
        jnp.asarray(b1, jnp.float32).reshape(1, H))
    # Residual folded into the weight: out2 @ W + out2 == out2 @ (W + I).
    wem_p = jnp.eye(H_pad, dtype=jnp.float32).at[:H, :H].add(
        jnp.asarray(wem_t, jnp.float32))
    # Softmax mask for padded columns baked into the bias.
    bem_p = jnp.full((1, H_pad), -1e30, jnp.float32).at[:, :H].set(
        jnp.asarray(bem, jnp.float32).reshape(1, H))
    return H, H_pad, w1_p, b1_p, wem_p, bem_p


def _pick_tiling(N, tile_n):
    """Balance the N tiling: big tiles (amortize ~0.35 us/step), but
    >= 4 steps when there is enough work (v7x dual-TC + double buffering),
    and padding waste bounded by < 1 tile after rebalancing."""
    n8 = _round_up(N, 8)
    tile = min(tile_n, n8)
    grid = pl.cdiv(n8, tile)
    min_steps = min(4, pl.cdiv(n8, 8))      # can't have more steps than rows/8
    grid = max(grid, min_steps)
    tile = _round_up(pl.cdiv(n8, grid), 8)  # rebalance -> near-zero tail waste
    n_pad = grid * tile
    return n_pad, tile, grid


def time_encode(t, params, *, tile_n=2048, out_dtype=jnp.float32,
                return_padded=False):
    """t: (N,) float timestamps; params: output of prepare_time_encode_params.

    tile_n is sweepable (2048-4096 recommended).  out_dtype=jnp.bfloat16 halves
    the (writeback-bound) output traffic if the consumer tolerates it.
    """
    H, H_pad, w1_p, b1_p, wem_p, bem_p = params
    t2 = jnp.asarray(t, jnp.float32).reshape(-1, 1)          # unsqueeze(1)
    N = t2.shape[0]

    N_pad, tile_n, grid_n = _pick_tiling(N, tile_n)
    t_p = jnp.zeros((N_pad, 1), jnp.float32).at[:N, :].set(t2)

    out = pl.pallas_call(
        time_encode_kernel,
        out_shape=jax.ShapeDtypeStruct((N_pad, H_pad), out_dtype),
        grid=(grid_n,),
        in_specs=[
            pl.BlockSpec((tile_n, 1), lambda i: (i, 0)),      # t tile
            pl.BlockSpec((1, H_pad), lambda i: (0, 0)),       # w1  (resident)
            pl.BlockSpec((1, H_pad), lambda i: (0, 0)),       # b1  (resident)
            pl.BlockSpec((H_pad, H_pad), lambda i: (0, 0)),   # W+I (resident)
            pl.BlockSpec((1, H_pad), lambda i: (0, 0)),       # bem (resident)
        ],
        out_specs=pl.BlockSpec((tile_n, H_pad), lambda i: (i, 0)),
        compiler_params=pltpu.CompilerParams(
            dimension_semantics=("parallel",),                # 2 TCs on v7x
            # No vmem_limit override: ~2.5 MiB needed at tile_n=2048,
            # H_pad=128 — well under the 32 MiB scoped default everywhere.
        ),
    )(t_p, w1_p, b1_p, wem_p, bem_p)

    if return_padded:
        # Consumers that can fuse the slice / accept padded layout avoid the
        # extra XLA slice pass (re-reads N_pad x H_pad, rewrites N x H).
        return out
    return out[:N, :H]


def init_params(key, H):
    """Deterministic synthetic parameter init (PyTorch-Linear-like uniform)."""
    k1, k2, k3, k4 = jax.random.split(key, 4)
    # w: Linear(1, H)  -> weight (H, 1), bias (H,);  bound = 1/sqrt(1)
    w1 = jax.random.uniform(k1, (1, H), jnp.float32, -1.0, 1.0)         # weight.T
    b1 = jax.random.uniform(k2, (1, H), jnp.float32, -1.0, 1.0)
    # em: Linear(H, H) -> weight (H, H), bias (H,);  bound = 1/sqrt(H)
    bound = 1.0 / (H ** 0.5)
    wem_t = jax.random.uniform(k3, (H, H), jnp.float32, -bound, bound)  # weight.T
    bem = jax.random.uniform(k4, (1, H), jnp.float32, -bound, bound)
    return w1, b1, wem_t, bem


def time_encode_ref(t, w1, b1, wem_t, bem):
    """Pure-JAX reference for correctness check."""
    t2 = t.astype(jnp.float32).reshape(-1, 1)
    out1 = t2 @ w1 + b1
    out2 = jnp.where(out1 >= 0, out1, 0.01 * out1)
    out = out2 @ wem_t + bem + out2
    return jax.nn.softmax(out, axis=1)


if __name__ == "__main__":
    N, H = 8, 32
    key = jax.random.PRNGKey(0)
    k_t, k_p = jax.random.split(key)
    t = jax.random.uniform(k_t, (N,), jnp.float32, 0.0, 100.0)  # timestamps
    w1, b1, wem_t, bem = init_params(k_p, H)

    # Parameter padding / residual fold done once, outside the call path.
    params = prepare_time_encode_params(w1, b1, wem_t, bem)

    out = time_encode(t, params)
    out = jax.block_until_ready(out)

    ref = time_encode_ref(t, w1, b1, wem_t, bem)
    assert out.shape == (N, H)
    assert jnp.allclose(out, ref, atol=1e-5, rtol=1e-5)
    assert jnp.allclose(jnp.sum(out, axis=1), jnp.ones((N,)), atol=1e-5)

    # Larger-N sanity check exercising the multi-step grid / tile rebalancing.
    N2 = 4100
    t2 = jax.random.uniform(jax.random.PRNGKey(1), (N2,), jnp.float32, 0.0, 100.0)
    out2 = jax.block_until_ready(time_encode(t2, params, tile_n=2048))
    ref2 = time_encode_ref(t2, w1, b1, wem_t, bem)
    assert out2.shape == (N2, H)
    assert jnp.allclose(out2, ref2, atol=1e-5, rtol=1e-5)

    print("KERNEL_OK")
</pallas_src>

<mosaic_0001>
module attributes {stable_mosaic.version = 11 : i64} {
  func.func @time_encode_kernel(%arg0: i32, %arg1: memref<8x1xf32, #tpu.memory_space<vmem>>, %arg2: memref<1x128xf32, #tpu.memory_space<vmem>>, %arg3: memref<1x128xf32, #tpu.memory_space<vmem>>, %arg4: memref<128x128xf32, #tpu.memory_space<vmem>>, %arg5: memref<1x128xf32, #tpu.memory_space<vmem>>, %arg6: memref<8x128xf32, #tpu.memory_space<vmem>>) attributes {dimension_semantics = [#tpu.dimension_semantics<parallel>], iteration_bounds = array<i64: 1>, scalar_prefetch = 0 : i64, scratch_operands = 0 : i64, tpu.core_type = #tpu.core_type<tc>, window_params = [{transform_indices = @transform_0, window_bounds = array<i64: 8, 1>}, {pipeline_mode = #tpu.pipeline_mode<synchronous>, transform_indices = @transform_1, window_bounds = array<i64: 1, 128>}, {pipeline_mode = #tpu.pipeline_mode<synchronous>, transform_indices = @transform_2, window_bounds = array<i64: 1, 128>}, {pipeline_mode = #tpu.pipeline_mode<synchronous>, transform_indices = @transform_3, window_bounds = array<i64: 128, 128>}, {pipeline_mode = #tpu.pipeline_mode<synchronous>, transform_indices = @transform_4, window_bounds = array<i64: 1, 128>}, {transform_indices = @transform_5, window_bounds = array<i64: 8, 128>}]} {
    %c0 = arith.constant 0 : index
    %c0_0 = arith.constant 0 : index
    %0 = vector.load %arg1[%c0, %c0_0] : memref<8x1xf32, #tpu.memory_space<vmem>>, vector<8x1xf32>
    %c0_1 = arith.constant 0 : index
    %c0_2 = arith.constant 0 : index
    %1 = vector.load %arg2[%c0_1, %c0_2] : memref<1x128xf32, #tpu.memory_space<vmem>>, vector<1x128xf32>
    %2 = vector.broadcast %0 : vector<8x1xf32> to vector<8x128xf32>
    %3 = vector.broadcast %1 : vector<1x128xf32> to vector<8x128xf32>
    %4 = arith.mulf %2, %3 : vector<8x128xf32>
    %c0_3 = arith.constant 0 : index
    %c0_4 = arith.constant 0 : index
    %5 = vector.load %arg3[%c0_3, %c0_4] : memref<1x128xf32, #tpu.memory_space<vmem>>, vector<1x128xf32>
    %6 = vector.broadcast %5 : vector<1x128xf32> to vector<8x128xf32>
    %7 = arith.addf %4, %6 : vector<8x128xf32>
    %cst = arith.constant 0.00999999977 : f32
    %8 = vector.broadcast %cst : f32 to vector<8x128xf32>
    %9 = arith.mulf %8, %7 : vector<8x128xf32>
    %10 = arith.maximumf %7, %9 : vector<8x128xf32>
    %c0_5 = arith.constant 0 : index
    %c0_6 = arith.constant 0 : index
    %11 = vector.load %arg4[%c0_5, %c0_6] : memref<128x128xf32, #tpu.memory_space<vmem>>, vector<128x128xf32>
    %cst_7 = arith.constant dense<0.000000e+00> : vector<8x128xf32>
    %12 = tpu.matmul %10, %11, %cst_7 {dimension_numbers = #tpu.dot_dimension_numbers<[1], [0], [0], [1], [0, 0, 1, 1], [], []>} : vector<8x128xf32>, vector<128x128xf32>, vector<8x128xf32> -> vector<8x128xf32>
    %c0_8 = arith.constant 0 : index
    %c0_9 = arith.constant 0 : index
    %13 = vector.load %arg5[%c0_8, %c0_9] : memref<1x128xf32, #tpu.memory_space<vmem>>, vector<1x128xf32>
    %14 = vector.broadcast %13 : vector<1x128xf32> to vector<8x128xf32>
    %15 = arith.addf %12, %14 : vector<8x128xf32>
    %cst_10 = arith.constant dense<0xFF800000> : vector<8xf32>
    %16 = vector.multi_reduction <maximumf>, %15, %cst_10 [1] : vector<8x128xf32> to vector<8xf32>
    %17 = vector.shape_cast %16 : vector<8xf32> to vector<8x1xf32>
    %18 = vector.broadcast %17 : vector<8x1xf32> to vector<8x128xf32>
    %19 = arith.subf %15, %18 : vector<8x128xf32>
    %20 = math.exp %19 : vector<8x128xf32>
    %cst_11 = arith.constant dense<0.000000e+00> : vector<8xf32>
    %21 = vector.multi_reduction <add>, %20, %cst_11 [1] : vector<8x128xf32> to vector<8xf32>
    %22 = vector.shape_cast %21 : vector<8xf32> to vector<8x1xf32>
    %23 = tpu.reciprocal %22 : vector<8x1xf32> -> vector<8x1xf32>
    %24 = vector.broadcast %23 : vector<8x1xf32> to vector<8x128xf32>
    %25 = arith.mulf %20, %24 : vector<8x128xf32>
    %c0_12 = arith.constant 0 : index
    %c0_13 = arith.constant 0 : index
    %26 = vector.load %arg6[%c0_12, %c0_13] : memref<8x128xf32, #tpu.memory_space<vmem>>, vector<8x128xf32>
    tpu.vector_store %arg6[%c0_12, %c0_13], %25 {strides = array<i32>} : memref<8x128xf32, #tpu.memory_space<vmem>>, vector<8x128xf32>,
    return
  }
  func.func @transform_0(%arg0: i32) -> (i32, i32) {
    %c0_i32 = arith.constant 0 : i32
    %c0_i32_0 = arith.constant 0 : i32
    return %arg0, %c0_i32 : i32, i32
  }
  func.func @transform_1(%arg0: i32) -> (i32, i32) {
    %c0_i32 = arith.constant 0 : i32
    %c0_i32_0 = arith.constant 0 : i32
    %c0_i32_1 = arith.constant 0 : i32
    return %c0_i32, %c0_i32_0 : i32, i32
  }
  func.func @transform_2(%arg0: i32) -> (i32, i32) {
    %c0_i32 = arith.constant 0 : i32
    %c0_i32_0 = arith.constant 0 : i32
    %c0_i32_1 = arith.constant 0 : i32
    return %c0_i32, %c0_i32_0 : i32, i32
  }
  func.func @transform_3(%arg0: i32) -> (i32, i32) {
    %c0_i32 = arith.constant 0 : i32
    %c0_i32_0 = arith.constant 0 : i32
    %c0_i32_1 = arith.constant 0 : i32
    return %c0_i32, %c0_i32_0 : i32, i32
  }
  func.func @transform_4(%arg0: i32) -> (i32, i32) {
    %c0_i32 = arith.constant 0 : i32
    %c0_i32_0 = arith.constant 0 : i32
    %c0_i32_1 = arith.constant 0 : i32
    return %c0_i32, %c0_i32_0 : i32, i32
  }
  func.func @transform_5(%arg0: i32) -> (i32, i32) {
    %c0_i32 = arith.constant 0 : i32
    %c0_i32_0 = arith.constant 0 : i32
    return %arg0, %c0_i32 : i32, i32
  }
}

</mosaic_0001>

<bundles_post_ra>
// kernel: tpu_custom_call.1
= control target key start
LH: loop header
LB: loop body
LE: loop exit
PB: predicated region body
PF: predicated region fallthrough
CT: control target
= control target key end

     0   :  { %10 = vsyncpa [#allocation3], 0  ;;  %s343_s0 = inlined_call_operand.vmem [shape: f32[8,1], index: 0, kind: input, shape index: {}]   ;;  %s344_s1 = inlined_call_operand.vmem [shape: f32[1,128], index: 1, kind: input, shape index: {}]   ;;  %s345_s2 = inlined_call_operand.vmem [shape: f32[1,128], index: 2, kind: input, shape index: {}]   ;;  %s346_s3 = inlined_call_operand.hbm [shape: f32[128,128], index: 3, kind: input, shape index: {}]   ;;  %s347_s4 = inlined_call_operand.vmem [shape: f32[1,128], index: 4, kind: input, shape index: {}]   ;;  %s348_s5 = inlined_call_operand.hbm [shape: f32[8,128], index: 5, kind: output, shape index: {}]  }
   0x1   :  { %11 = vsyncpa [#allocation4], 0  ;;  %s288_s18 = smov [#allocation2]  }
   0x2   :  { %s23_s19 = sshll.u32 %s288_s18, 4  ;;  %s24_s19 = int_to_ptr.vmem [resolvable:$true] %s23_s19 }
   0x3   :  { %s252_s20 = scalar_lea.vmem %s24_s19, 2048  ;;  %p257_p1 = scmp.lt.s32.totalorder %s24_s19, %s24_s19 }
   0x4   :  { %p253_p0 = scmp.ne.s32.totalorder %s24_s19, %s252_s20  ;;  %p258_p2 = scmp.lt.s32.totalorder %s252_s20, %s252_s20 }
   0x6   :  { %p259_p3 = por %p258_p2, %p257_p1 }
   0x8   :  { %p260_p4 = pnand %p259_p3, %p253_p0 }
   0xa   :  { %263 = shalt.err (!%p260_p4)
}
   0xb   :  { %s289_s21 = smov 128   ;;  %s290_s22 = smov 8  }
   0xc   :  { %29 = dma.hbm_to_vmem [thread:$0]  %s346_s3, 2048, %s24_s19, [#allocation3], %s289_s21, %s289_s21, %s290_s22  }
   0xd   :  { %284 = dma.done.wait [#allocation3], 2048  }
   0xe   :  { %285 = vsyncadd [#allocation3], 4294965248  ;;  %v291_v0 = vmov 0   ;;  %v292_v1 = vmov 0.0   ;;  %v35_v2 = vld [vmem:[%s343_s0] sm:$0xff]  ;;  %v74_v3 = vld [vmem:[#allocation2 + $0x78] sm:$0xff] }
   0xf   :  { %239 = vset.pattern.permute.xlu0 %v291_v0  ;;  %197 = vmatprep.subr.mxu0 %v292_v1  ;;  %v73_v4 = vld [vmem:[#allocation2 + $0x70] sm:$0xff]  ;;  %v72_v5 = vld [vmem:[#allocation2 + $0x68] sm:$0xff]  ;;  %vm293_vm0 = vmmov 0   ;;  %v71_v6 = vld [vmem:[#allocation2 + $0x60] sm:$0xff] }
  0x10   :  { %39 = vperm.xlu0 %239, %v35_v2   ;;  %198 = vmatpush3.msra.mxu0 %v74_v3  ;;  %v70_v7 = vld [vmem:[#allocation2 + $0x58] sm:$0xff]  ;;  %v69_v8 = vld [vmem:[#allocation2 + $0x50] sm:$0xff]  ;;  %v68_v9 = vld [vmem:[#allocation2 + $0x48] sm:$0xff] }
  0x11   :  { %199 = vmatprep.subr.mxu0 %v292_v1  ;;  %229 = vmatprep.mubr.msk.f32.mxu0 %vm293_vm0, %v292_v1  ;;  %v67_v10 = vld [vmem:[#allocation2 + $0x40] sm:$0xff]  ;;  %v66_v11 = vld [vmem:[#allocation2 + $0x38] sm:$0xff]  ;;  %v65_v12 = vld [vmem:[#allocation2 + $0x30] sm:$0xff] }
  0x12   :  { %200 = vmatpush3.msra.mxu0 %v73_v4  ;;  %v64_v13 = vld [vmem:[#allocation2 + $0x28] sm:$0xff]  ;;  %v63_v14 = vld [vmem:[#allocation2 + $0x20] sm:$0xff]  ;;  %v62_v15 = vld [vmem:[#allocation2 + $0x18] sm:$0xff] }
  0x13   :  { %201 = vmatprep.subr.mxu0 %v292_v1  ;;  %v61_v16 = vld [vmem:[#allocation2 + $0x10] sm:$0xff]  ;;  %v60_v17 = vld [vmem:[#allocation2 + $0x8] sm:$0xff]  ;;  %v59_v18 = vld [vmem:[#allocation2] sm:$0xff] }
  0x14   :  { %202 = vmatpush3.msra.mxu0 %v72_v5  ;;  %v177_v19 = vld [vmem:[%s344_s1] ss:$0 sm:$0xff]  ;;  %s294_s1 = smov [#allocation5]  }
  0x15   :  { %203 = vmatprep.subr.mxu0 %v292_v1  ;;  %v178_v20 = vld [vmem:[%s345_s2] ss:$0 sm:$0xff]  ;;  %s168_s2 = sshll.u32 %s294_s1, 4  ;;  %s169_s2 = int_to_ptr.vmem [resolvable:$true] %s168_s2 }
  0x16   :  { %204 = vmatpush3.msra.mxu0 %v71_v6  ;;  %v179_v26 = vld [vmem:[%s347_s4] ss:$0 sm:$0xff]  ;;  %s264_s6 = scalar_lea.vmem %s169_s2, 128  ;;  %p269_p6 = scmp.lt.s32.totalorder %s169_s2, %s169_s2 }
  0x17   :  { %205 = vmatprep.subr.mxu0 %v292_v1  ;;  %p265_p5 = scmp.ne.s32.totalorder %s169_s2, %s264_s6  ;;  %p270_p7 = scmp.lt.s32.totalorder %s264_s6, %s264_s6 }
  0x18   :  { %206 = vmatpush3.msra.mxu0 %v70_v7 }
  0x19   :  { %207 = vmatprep.subr.mxu0 %v292_v1  ;;  %p271_p8 = por %p270_p7, %p269_p6 }
  0x1a   :  { %208 = vmatpush3.msra.mxu0 %v69_v8 }
  0x1b   :  { %209 = vmatprep.subr.mxu0 %v292_v1  ;;  %p272_p9 = pnand %p271_p8, %p265_p5 }
  0x1c   :  { %210 = vmatpush3.msra.mxu0 %v68_v9 }
  0x1d   :  { %211 = vmatprep.subr.mxu0 %v292_v1 }
  0x1e   :  { %212 = vmatpush3.msra.mxu0 %v67_v10 }
  0x1f   :  { %213 = vmatprep.subr.mxu0 %v292_v1 }
  0x20   :  { %214 = vmatpush3.msra.mxu0 %v66_v11 }
  0x21   :  { %215 = vmatprep.subr.mxu0 %v292_v1 }
  0x22   :  { %216 = vmatpush3.msra.mxu0 %v65_v12 }
  0x23   :  { %217 = vmatprep.subr.mxu0 %v292_v1 }
  0x24   :  { %218 = vmatpush3.msra.mxu0 %v64_v13 }
  0x25   :  { %219 = vmatprep.subr.mxu0 %v292_v1 }
  0x26   :  { %220 = vmatpush3.msra.mxu0 %v63_v14 }
  0x27   :  { %221 = vmatprep.subr.mxu0 %v292_v1 }
  0x28   :  { %222 = vmatpush3.msra.mxu0 %v62_v15 }
  0x29   :  { %223 = vmatprep.subr.mxu0 %v292_v1 }
  0x2a   :  { %224 = vmatpush3.msra.mxu0 %v61_v16 }
  0x2b   :  { %225 = vmatprep.subr.mxu0 %v292_v1 }
  0x2c   :  { %226 = vmatpush3.msra.mxu0 %v60_v17 }
  0x2d   :  { %227 = vmatprep.subr.mxu0 %v292_v1 }
  0x2e   :  { %228 = vmatpush3.msra.mxu0 %v59_v18 }
  0x8b   :  { %v40_v21 = vpop.permute.xlu0 %39 }
  0x8c   :  { %v48_v22 = vmul.f32 %v177_v19, %v40_v21 }
  0x8e   :  { %v56_v23 = vadd.f32 %v178_v20, %v48_v22 }
  0x90   :  { %v57_v24 = vmul.f32 0.01, %v56_v23 }
  0x92   :  { %v58_v25 = vmax.f32 %v56_v23, %v57_v24 }
  0x94   :  { %230 = vmatmul.mubr.f32.vlgmr.msra.gmra.mxu0 %v58_v25 }
 0x154   :  { %v148_v27 = vpop.f32.mrf.mxu0 }
 0x155   :  { %v149_v28 = vadd.f32 %v179_v26, %v148_v27 }
 0x156   :  { %v231_v29 = vpop.f32.mrf.mxu0 }
 0x157   :  { %152 = vmax.xlane.f32.xlu0 %v149_v28 }
 0x1e0   :  { %v153_v30 = vpop.xlane.xlu0 %152 }
 0x1e1   :  { %v154_v31 = vsub.f32 %v149_v28, %v153_v30 }
 0x1e3   :  { %v155_v32 = vmul.f32 1.442695, %v154_v31 }
 0x1e5   :  { %240 = vpow2.f32 %v155_v32 }
 0x1f2   :  { %v241_v33 = vpop.eup %240 }
 0x1f3   :  { %157 = vadd.xlane.f32.xlu1 %v241_v33 }
 0x27c   :  { %v158_v34 = vpop.xlane.xlu1 %157 }
 0x27d   :  { %242 = vrcp.f32 %v158_v34 }
 0x28a   :  { %v243_v35 = vpop.eup %242 }
 0x28b   :  { %v160_v36 = vmul.f32 %v243_v35, %v241_v33 }
 0x28d   :  { %161 = vst [vmem:[#allocation5] sm:$0xff] %v160_v36 }
 0x28e   :  { %275 = shalt.err (!%p272_p9)
}
 0x28f   :  { %171 = dma.vmem_to_hbm [thread:$0]  %s169_s2, 128, %s348_s5, [#allocation4]  }
 0x290   :  { %286 = dma.done.wait [#allocation4], 128  }
 0x291   :  { %287 = vsyncadd [#allocation4], 4294967168 }
 0x292   :  { %175 = vsyncpa [#allocation3], 1 }
 0x293   :  { %176 = vsyncpa [#allocation4], 1 }

</bundles_post_ra>
